<compile_context>
chip_gen: v5e
topology: v5e:2x2
jax: 0.10.0
libtpu: 0.0.40
codegen_flags: <defaults>
</compile_context>

<pallas_src>
import jax
import jax.numpy as jnp
from jax import lax
from jax.experimental import pallas as pl
from jax.experimental.pallas import tpu as pltpu


# ----------------------------------------------------------------------------- kernel
def _proj_kernel(feat_ref, w_ref, b_ref, o_ref):
    """One grid step: project a (tile_m, Cf) slab of pixels to (tile_m, E)."""
    acc = jnp.dot(feat_ref[...], w_ref[...], preferred_element_type=jnp.float32)
    o_ref[...] = (acc + b_ref[...]).astype(o_ref.dtype)


def hybrid_embed_project(feat_nchw, proj_w, proj_b, *, tile_m=128,
                         out_dtype=jnp.float32):
    """Pallas version of `proj(feat).flatten(2).transpose(1, 2)`.

    feat_nchw : (B, Cf, H, W) backbone feature map
    proj_w    : (E, Cf, 1, 1) Conv2d weight (PyTorch layout)
    proj_b    : (E,)          Conv2d bias
    returns   : (B, H*W, E)
    """
    B, Cf, H, W = feat_nchw.shape
    E = proj_w.shape[0]
    N = H * W
    M = B * N
    assert tile_m % 8 == 0, "tile_m must be sublane-aligned (multiple of 8)"

    # --- layout plumbing in the wrapper (XLA), not in the kernel -------------
    # channel-last + flatten batch*spatial into one MXU-friendly M dim
    feat = jnp.transpose(feat_nchw, (0, 2, 3, 1)).reshape(M, Cf)

    # pad M to a multiple of tile_m, and to an even tile count for v7x's 2 TCs
    tiles = -(-M // tile_m)
    if tiles > 1 and tiles % 2:
        tiles += 1
    m_pad = tiles * tile_m
    if m_pad != M:
        feat = jnp.pad(feat, ((0, m_pad - M), (0, 0)))

    # bf16 MXU inputs (halves DMA bytes too); weight pre-transposed once to (Cf, E)
    feat_b = feat.astype(jnp.bfloat16)
    w_ce = jnp.transpose(proj_w.reshape(E, Cf)).astype(jnp.bfloat16)   # (Cf, E)
    b2 = proj_b.reshape(1, E).astype(jnp.float32)

    grid_spec = pltpu.PrefetchScalarGridSpec(
        num_scalar_prefetch=0,
        grid=(tiles,),
        in_specs=[
            pl.BlockSpec((tile_m, Cf), lambda i: (i, 0)),   # pixel slab
            pl.BlockSpec((Cf, E), lambda i: (0, 0)),        # weight (constant)
            pl.BlockSpec((1, E), lambda i: (0, 0)),         # bias   (constant)
        ],
        out_specs=pl.BlockSpec((tile_m, E), lambda i: (i, 0)),
    )

    out = pl.pallas_call(
        _proj_kernel,
        out_shape=jax.ShapeDtypeStruct((m_pad, E), out_dtype),
        grid_spec=grid_spec,
        compiler_params=pltpu.CompilerParams(dimension_semantics=("parallel",)),
    )(feat_b, w_ce, b2)

    return out[:M].reshape(B, N, E)


# -------------------------------------------------------------------- stand-in backbone
# TODO(synk): the real HybridEmbed backbone is an arbitrary external CNN nn.Module;
# it has no generic Pallas translation, so it runs as plain XLA ops here.
def _toy_backbone(x, p):
    y = lax.conv_general_dilated(x, p["w1"], (2, 2), "SAME",
                                 dimension_numbers=("NCHW", "OIHW", "NCHW"))
    y = jax.nn.relu(y + p["b1"][None, :, None, None])
    y = lax.conv_general_dilated(y, p["w2"], (2, 2), "SAME",
                                 dimension_numbers=("NCHW", "OIHW", "NCHW"))
    y = jax.nn.relu(y + p["b2"][None, :, None, None])
    return y


def hybrid_embed_forward(x, backbone_params, proj_w, proj_b, *, tile_m=128):
    feat = _toy_backbone(x, backbone_params)          # (B, Cf, h, w)
    return hybrid_embed_project(feat, proj_w, proj_b, tile_m=tile_m)


def hybrid_embed_reference(x, backbone_params, proj_w, proj_b):
    """Pure-JAX mirror of the PyTorch module (f32 everywhere), for validation."""
    feat = _toy_backbone(x, backbone_params)
    y = lax.conv_general_dilated(feat, proj_w, (1, 1), "VALID",
                                 dimension_numbers=("NCHW", "OIHW", "NCHW"))
    y = y + proj_b[None, :, None, None]
    B, E, h, w = y.shape
    return y.reshape(B, E, h * w).transpose(0, 2, 1)   # flatten(2).transpose(1, 2)


# ----------------------------------------------------------------------------- main
if __name__ == "__main__":
    B, in_chans, img = 2, 3, 32
    feat_dim, embed_dim = 32, 128

    key = jax.random.PRNGKey(0)
    k = jax.random.split(key, 7)

    x = jax.random.normal(k[0], (B, in_chans, img, img), dtype=jnp.float32)

    backbone_params = {
        "w1": jax.random.normal(k[1], (16, in_chans, 3, 3), jnp.float32) * 0.2,
        "b1": jax.random.normal(k[2], (16,), jnp.float32) * 0.1,
        "w2": jax.random.normal(k[3], (feat_dim, 16, 3, 3), jnp.float32) * 0.1,
        "b2": jax.random.normal(k[4], (feat_dim,), jnp.float32) * 0.1,
    }
    # nn.Conv2d(feature_dim, embed_dim, kernel_size=1) parameters (PyTorch layout)
    proj_w = jax.random.normal(k[5], (embed_dim, feat_dim, 1, 1), jnp.float32) * 0.05
    proj_b = jax.random.normal(k[6], (embed_dim,), jnp.float32) * 0.01

    out = hybrid_embed_forward(x, backbone_params, proj_w, proj_b, tile_m=128)
    out = jax.block_until_ready(out)

    ref = hybrid_embed_reference(x, backbone_params, proj_w, proj_b)
    assert out.shape == ref.shape, (out.shape, ref.shape)
    # bf16 matmul inputs vs f32 reference -> loose tolerance
    assert jnp.allclose(out, ref, atol=2e-2, rtol=2e-2), "Pallas kernel mismatch vs reference"

    print("KERNEL_OK")
</pallas_src>

<mosaic_0001>
module attributes {stable_mosaic.version = 11 : i64} {
  func.func @_proj_kernel(%arg0: i32, %arg1: memref<128x32xbf16, #tpu.memory_space<vmem>>, %arg2: memref<32x128xbf16, #tpu.memory_space<vmem>>, %arg3: memref<1x128xf32, #tpu.memory_space<vmem>>, %arg4: memref<128x128xf32, #tpu.memory_space<vmem>>) attributes {dimension_semantics = [#tpu.dimension_semantics<parallel>], iteration_bounds = array<i64: 1>, scalar_prefetch = 0 : i64, scratch_operands = 0 : i64, tpu.core_type = #tpu.core_type<tc>, window_params = [{transform_indices = @transform_0, window_bounds = array<i64: 128, 32>}, {pipeline_mode = #tpu.pipeline_mode<synchronous>, transform_indices = @transform_1, window_bounds = array<i64: 32, 128>}, {pipeline_mode = #tpu.pipeline_mode<synchronous>, transform_indices = @transform_2, window_bounds = array<i64: 1, 128>}, {transform_indices = @transform_3, window_bounds = array<i64: 128, 128>}]} {
    %c0 = arith.constant 0 : index
    %c0_0 = arith.constant 0 : index
    %0 = vector.load %arg1[%c0, %c0_0] : memref<128x32xbf16, #tpu.memory_space<vmem>>, vector<128x32xbf16>
    %c0_1 = arith.constant 0 : index
    %c0_2 = arith.constant 0 : index
    %1 = vector.load %arg2[%c0_1, %c0_2] : memref<32x128xbf16, #tpu.memory_space<vmem>>, vector<32x128xbf16>
    %cst = arith.constant dense<0.000000e+00> : vector<128x128xf32>
    %2 = tpu.matmul %0, %1, %cst {dimension_numbers = #tpu.dot_dimension_numbers<[1], [0], [0], [1], [0, 0, 1, 1], [], []>} : vector<128x32xbf16>, vector<32x128xbf16>, vector<128x128xf32> -> vector<128x128xf32>
    %c0_3 = arith.constant 0 : index
    %c0_4 = arith.constant 0 : index
    %3 = vector.load %arg3[%c0_3, %c0_4] : memref<1x128xf32, #tpu.memory_space<vmem>>, vector<1x128xf32>
    %4 = vector.broadcast %3 : vector<1x128xf32> to vector<128x128xf32>
    %5 = arith.addf %2, %4 : vector<128x128xf32>
    %c0_5 = arith.constant 0 : index
    %c0_6 = arith.constant 0 : index
    %6 = vector.load %arg4[%c0_5, %c0_6] : memref<128x128xf32, #tpu.memory_space<vmem>>, vector<128x128xf32>
    tpu.vector_store %arg4[%c0_5, %c0_6], %5 {strides = array<i32>} : memref<128x128xf32, #tpu.memory_space<vmem>>, vector<128x128xf32>,
    return
  }
  func.func @transform_0(%arg0: i32) -> (i32, i32) {
    %c0_i32 = arith.constant 0 : i32
    %c0_i32_0 = arith.constant 0 : i32
    return %arg0, %c0_i32 : i32, i32
  }
  func.func @transform_1(%arg0: i32) -> (i32, i32) {
    %c0_i32 = arith.constant 0 : i32
    %c0_i32_0 = arith.constant 0 : i32
    %c0_i32_1 = arith.constant 0 : i32
    return %c0_i32, %c0_i32_0 : i32, i32
  }
  func.func @transform_2(%arg0: i32) -> (i32, i32) {
    %c0_i32 = arith.constant 0 : i32
    %c0_i32_0 = arith.constant 0 : i32
    %c0_i32_1 = arith.constant 0 : i32
    return %c0_i32, %c0_i32_0 : i32, i32
  }
  func.func @transform_3(%arg0: i32) -> (i32, i32) {
    %c0_i32 = arith.constant 0 : i32
    %c0_i32_0 = arith.constant 0 : i32
    return %arg0, %c0_i32 : i32, i32
  }
}

</mosaic_0001>

<bundles_post_ra>
// kernel: tpu_custom_call.1
= control target key start
LH: loop header
LB: loop body
LE: loop exit
PB: predicated region body
PF: predicated region fallthrough
CT: control target
= control target key end

     0   :  { %s361_s0 = inlined_call_operand.vmem [shape: bf16[128,32], index: 0, kind: input, shape index: {}]   ;;  %s362_s1 = inlined_call_operand.vmem [shape: bf16[32,128], index: 1, kind: input, shape index: {}]   ;;  %s363_s2 = inlined_call_operand.vmem [shape: f32[1,128], index: 2, kind: input, shape index: {}]   ;;  %s364_s3 = inlined_call_operand.hbm [shape: f32[128,128], index: 3, kind: output, shape index: {}]  }
   0x1   :  { %v257_v0 = vld [vmem:[%s362_s1 + $0x8] sm:$0xff]  ;;  %v256_v1 = vld [vmem:[%s362_s1] sm:$0xff] }
   0x2   :  { %123 = vmatpush.bf16.msra.mxu0 %v257_v0  ;;  %258 = vmatpush.bf16.msra.mxu1 %v257_v0 }
   0x3   :  { %259 = vmatpush.bf16.msra.mxu2 %v257_v0  ;;  %260 = vmatpush.bf16.msra.mxu3 %v257_v0 }
   0x4   :  { %8 = vsyncpa [#allocation3], 0  ;;  %v248_v2 = vld [vmem:[%s361_s0] sm:$0xff]  ;;  %v250_v3 = vld [vmem:[%s361_s0 + $0x10] sm:$0xff]  ;;  %vm92_vm0 = vcmask 261120   ;;  %s188_s8 = sshll.u32 %s364_s3, 4  ;;  %s189_s8 = int_to_ptr.hbm [resolvable:$true] %s188_s8 }
   0x5   :  { %v252_v4 = vld [vmem:[%s361_s0 + $0x20] sm:$0xff]  ;;  %v254_v5 = vld [vmem:[%s361_s0 + $0x30] sm:$0xff]  ;;  %v249_v6 = vld [vmem:[%s361_s0 + $0x8] sm:$0xff]  ;;  %s295_s9 = smov 128   ;;  %s296_s10 = smov 8  }
   0x6   :  { %124 = vmatpush.bf16.msra.mxu0 %v256_v1  ;;  %261 = vmatpush.bf16.msra.mxu1 %v256_v1  ;;  %v251_v7 = vld [vmem:[%s361_s0 + $0x18] sm:$0xff]  ;;  %v253_v8 = vld [vmem:[%s361_s0 + $0x28] sm:$0xff]  ;;  %v267_v10 = vld [vmem:[%s363_s2] ss:$0 sm:$0xff] }
   0x7   :  { %262 = vmatpush.bf16.msra.mxu2 %v256_v1  ;;  %263 = vmatpush.bf16.msra.mxu3 %v256_v1  ;;  %v255_v9 = vld [vmem:[%s361_s0 + $0x38] sm:$0xff]  ;;  %s294_s0 = smov [#allocation2]  }
   0x8   :  { %s186_s2 = sshll.u32 %s294_s0, 4  ;;  %s187_s2 = int_to_ptr.vmem [resolvable:$true] %s186_s2 }
   0x9   :  { %240 = vmatmul.msk.bf16.vlgmr.msra.gmra.mxu0 %vm92_vm0, %v248_v2  ;;  %242 = vmatmul.msk.bf16.vlgmr.msra.gmra.mxu1 %vm92_vm0, %v250_v3 }
   0xa   :  { %244 = vmatmul.msk.bf16.vlgmr.msra.gmra.mxu2 %vm92_vm0, %v252_v4  ;;  %246 = vmatmul.msk.bf16.vlgmr.msra.gmra.mxu3 %vm92_vm0, %v254_v5 }
  0x19   :  { %241 = vmatmul.msk.bf16.gmra.mxu0 %vm92_vm0, %v249_v6  ;;  %243 = vmatmul.msk.bf16.gmra.mxu1 %vm92_vm0, %v251_v7 }
  0x1a   :  { %245 = vmatmul.msk.bf16.gmra.mxu2 %vm92_vm0, %v253_v8  ;;  %247 = vmatmul.msk.bf16.gmra.mxu3 %vm92_vm0, %v255_v9 }
  0x86   :  { %v126_v11 = vpop.f32.mrf.mxu0  ;;  %v136_v12 = vpop.f32.mrf.mxu1 }
  0x87   :  { %v127_v13 = vadd.f32 %v267_v10, %v126_v11  ;;  %v137_v14 = vadd.f32 %v267_v10, %v136_v12 }
  0x89   :  { %166 = vst [vmem:[#allocation2] sm:$0xff] %v127_v13 }
  0x8a   :  { %170 = vst [vmem:[#allocation2 + $0x20] sm:$0xff] %v137_v14 }
  0x8d   :  { %v146_v15 = vpop.f32.mrf.mxu2  ;;  %v156_v16 = vpop.f32.mrf.mxu3 }
  0x8e   :  { %v147_v17 = vadd.f32 %v267_v10, %v146_v15  ;;  %v157_v18 = vadd.f32 %v267_v10, %v156_v16  ;;  %v128_v19 = vpop.f32.mrf.mxu0  ;;  %v138_v20 = vpop.f32.mrf.mxu1 }
  0x8f   :  { %v129_v21 = vadd.f32 %v267_v10, %v128_v19  ;;  %v139_v22 = vadd.f32 %v267_v10, %v138_v20 }
  0x90   :  { %174 = vst [vmem:[#allocation2 + $0x40] sm:$0xff] %v147_v17 }
  0x91   :  { %178 = vst [vmem:[#allocation2 + $0x60] sm:$0xff] %v157_v18 }
  0x92   :  { %167 = vst [vmem:[#allocation2 + $0x8] sm:$0xff] %v129_v21 }
  0x93   :  { %171 = vst [vmem:[#allocation2 + $0x28] sm:$0xff] %v139_v22 }
  0x95   :  { %v148_v23 = vpop.f32.mrf.mxu2  ;;  %v158_v24 = vpop.f32.mrf.mxu3 }
  0x96   :  { %v149_v25 = vadd.f32 %v267_v10, %v148_v23  ;;  %v159_v26 = vadd.f32 %v267_v10, %v158_v24  ;;  %v131_v27 = vpop.f32.mrf.mxu0  ;;  %v141_v28 = vpop.f32.mrf.mxu1 }
  0x97   :  { %v132_v29 = vadd.f32 %v267_v10, %v131_v27  ;;  %v142_v30 = vadd.f32 %v267_v10, %v141_v28 }
  0x98   :  { %175 = vst [vmem:[#allocation2 + $0x48] sm:$0xff] %v149_v25 }
  0x99   :  { %179 = vst [vmem:[#allocation2 + $0x68] sm:$0xff] %v159_v26 }
  0x9a   :  { %168 = vst [vmem:[#allocation2 + $0x10] sm:$0xff] %v132_v29 }
  0x9b   :  { %172 = vst [vmem:[#allocation2 + $0x30] sm:$0xff] %v142_v30 }
  0x9d   :  { %v151_v31 = vpop.f32.mrf.mxu2  ;;  %v161_v32 = vpop.f32.mrf.mxu3 }
  0x9e   :  { %v152_v33 = vadd.f32 %v267_v10, %v151_v31  ;;  %v162_v34 = vadd.f32 %v267_v10, %v161_v32  ;;  %v133_v35 = vpop.f32.mrf.mxu0  ;;  %v143_v36 = vpop.f32.mrf.mxu1 }
  0x9f   :  { %v134_v37 = vadd.f32 %v267_v10, %v133_v35  ;;  %v144_v38 = vadd.f32 %v267_v10, %v143_v36 }
  0xa0   :  { %176 = vst [vmem:[#allocation2 + $0x50] sm:$0xff] %v152_v33 }
  0xa1   :  { %180 = vst [vmem:[#allocation2 + $0x70] sm:$0xff] %v162_v34 }
  0xa2   :  { %169 = vst [vmem:[#allocation2 + $0x18] sm:$0xff] %v134_v37 }
  0xa3   :  { %173 = vst [vmem:[#allocation2 + $0x38] sm:$0xff] %v144_v38 }
  0xa5   :  { %v153_v39 = vpop.f32.mrf.mxu2  ;;  %v163_v40 = vpop.f32.mrf.mxu3 }
  0xa6   :  { %v154_v41 = vadd.f32 %v267_v10, %v153_v39  ;;  %v164_v42 = vadd.f32 %v267_v10, %v163_v40 }
  0xa8   :  { %177 = vst [vmem:[#allocation2 + $0x58] sm:$0xff] %v154_v41 }
  0xa9   :  { %181 = vst [vmem:[#allocation2 + $0x78] sm:$0xff] %v164_v42 }
  0xaa   :  { %194 = dma.vmem_to_hbm [thread:$0]  %s187_s2, 2048, %s189_s8, [#allocation3], %s295_s9, %s295_s9, %s296_s10  }
  0xab   :  { %292 = dma.done.wait [#allocation3], 2048  }
  0xac   :  { %293 = vsyncadd [#allocation3], 4294965248 }
  0xad   :  { %199 = vsyncpa [#allocation3], 1 }

</bundles_post_ra>
